<compile_context>
chip_gen: v5e
topology: v5e:2x2
jax: 0.10.0
libtpu: 0.0.40
codegen_flags: <defaults>
</compile_context>

<pallas_src>
import jax
import jax.numpy as jnp
from jax.experimental import pallas as pl
from jax.experimental.pallas import tpu as pltpu

INPUT_SIZE = 1
HIDDEN = 32


def rnn_kernel(x_ref, h0_ref, w_ih_ref, w_hh_ref, b_ref, w_out_ref, b_out_ref,
               y_ref, hfin_ref):
    # All operands are fully resident in VMEM (b_out in SMEM).
    x = x_ref[...]              # (B, T)   input_size==1 squeezed on host
    h = h0_ref[...]             # (B, H)
    w_ih_row = w_ih_ref[...]    # (1, H)   == W_ih^T for input_size 1
    w_hh = w_hh_ref[...]        # (H, H)   == W_hh^T
    b = b_ref[...]              # (1, H)   == b_ih + b_hh
    w_out_row = w_out_ref[...]  # (1, H)   == W_out (1, H)
    b_out = b_out_ref[0]        # scalar from SMEM

    T = x.shape[1]              # static (known at trace time)

    # Statically unrolled recurrence; h is a traced value carried through the
    # unrolled loop, so there is no per-step grid / DMA overhead at all.
    for t in range(T):
        x_t = x[:, t:t + 1]                                   # (B, 1)
        pre = x_t * w_ih_row                                  # VPU outer product
        pre = pre + jnp.dot(h, w_hh,
                            preferred_element_type=jnp.float32)  # MXU (B,H)@(H,H)
        h = jnp.tanh(pre + b)

        # Linear(32, 1): VPU multiply + cross-lane reduce (off the MXU).
        y_t = jnp.sum(h * w_out_row, axis=-1, keepdims=True) + b_out  # (B, 1)
        y_ref[:, t:t + 1] = y_t                               # VMEM store (static idx)

    # Final hidden state written exactly once.
    hfin_ref[...] = h


def rnn_forward(x, h_state, params):
    """x: (B, T, 1) float32; h_state: (1, B, H) or None. Returns (y (B,T,1), h (1,B,H))."""
    B, T, I = x.shape
    assert I == INPUT_SIZE
    H = HIDDEN

    if h_state is None:
        h0 = jnp.zeros((B, H), jnp.float32)
    else:
        h0 = h_state.reshape(B, H)

    w_ih, w_hh, b_ih, b_hh, w_out, b_out = params
    # Host-side (glue) parameter prep: transposes / bias folding.
    w_ih_row = w_ih.reshape(1, H)           # (H, 1) -> (1, H)
    w_hh_t = w_hh.T                          # (H, H)
    b_comb = (b_ih + b_hh).reshape(1, H)     # fold the two biases
    w_out_row = w_out.reshape(1, H)          # (1, H)
    b_out_1 = b_out.reshape(1).astype(jnp.float32)  # SMEM scalar

    x_bt = x[:, :, 0].astype(jnp.float32)    # (B, T), input_size==1

    vmem = pl.BlockSpec(memory_space=pltpu.MemorySpace.VMEM)
    smem = pl.BlockSpec(memory_space=pltpu.MemorySpace.SMEM)

    y_bt, h_fin = pl.pallas_call(
        rnn_kernel,
        out_shape=(
            jax.ShapeDtypeStruct((B, T), jnp.float32),   # y, lane-dense (B, T)
            jax.ShapeDtypeStruct((B, H), jnp.float32),   # final hidden
        ),
        in_specs=[vmem, vmem, vmem, vmem, vmem, vmem, smem],
        out_specs=(vmem, vmem),
    )(x_bt, h0, w_ih_row, w_hh_t, b_comb, w_out_row, b_out_1)

    y = y_bt[:, :, None]                     # (B, T, 1)
    return y, h_fin.reshape(1, B, H)


def init_params(key):
    """Deterministic init mirroring PyTorch's U(-1/sqrt(H), 1/sqrt(H))."""
    H, I = HIDDEN, INPUT_SIZE
    bound = 1.0 / jnp.sqrt(jnp.float32(H))
    ks = jax.random.split(key, 6)
    w_ih = jax.random.uniform(ks[0], (H, I), jnp.float32, -bound, bound)
    w_hh = jax.random.uniform(ks[1], (H, H), jnp.float32, -bound, bound)
    b_ih = jax.random.uniform(ks[2], (H,), jnp.float32, -bound, bound)
    b_hh = jax.random.uniform(ks[3], (H,), jnp.float32, -bound, bound)
    w_out = jax.random.uniform(ks[4], (1, H), jnp.float32, -bound, bound)
    b_out = jax.random.uniform(ks[5], (1,), jnp.float32, -bound, bound)
    return (w_ih, w_hh, b_ih, b_hh, w_out, b_out)


def rnn_forward_ref(x, h_state, params):
    """Pure-JAX reference of the same forward pass."""
    w_ih, w_hh, b_ih, b_hh, w_out, b_out = params
    B, T, I = x.shape
    h = jnp.zeros((B, HIDDEN), jnp.float32) if h_state is None else h_state.reshape(B, HIDDEN)

    def step(h, x_t):
        h_new = jnp.tanh(x_t @ w_ih.T + b_ih + h @ w_hh.T + b_hh)
        y_t = h_new @ w_out.T + b_out
        return h_new, y_t

    h_fin, ys = jax.lax.scan(step, h, jnp.transpose(x, (1, 0, 2)))
    return jnp.transpose(ys, (1, 0, 2)), h_fin.reshape(1, B, HIDDEN)


if __name__ == "__main__":
    key = jax.random.PRNGKey(0)
    pkey, xkey, hkey = jax.random.split(key, 3)

    B, T = 2, 8
    params = init_params(pkey)
    x = jax.random.normal(xkey, (B, T, INPUT_SIZE), jnp.float32)
    h_state = jax.random.normal(hkey, (1, B, HIDDEN), jnp.float32) * 0.1

    y, h_out = rnn_forward(x, h_state, params)
    y = jax.block_until_ready(y)
    h_out = jax.block_until_ready(h_out)

    y_ref, h_ref = rnn_forward_ref(x, h_state, params)
    assert y.shape == (B, T, 1) and h_out.shape == (1, B, HIDDEN)
    assert jnp.allclose(y, y_ref, atol=1e-5, rtol=1e-5)
    assert jnp.allclose(h_out, h_ref, atol=1e-5, rtol=1e-5)

    print("KERNEL_OK")
</pallas_src>

<mosaic_0001>
module attributes {stable_mosaic.version = 11 : i64} {
  func.func @rnn_kernel(%arg0: memref<2x8xf32, #tpu.memory_space<vmem>>, %arg1: memref<2x32xf32, #tpu.memory_space<vmem>>, %arg2: memref<1x32xf32, #tpu.memory_space<vmem>>, %arg3: memref<32x32xf32, #tpu.memory_space<vmem>>, %arg4: memref<1x32xf32, #tpu.memory_space<vmem>>, %arg5: memref<1x32xf32, #tpu.memory_space<vmem>>, %arg6: memref<1xf32, #tpu.memory_space<smem>>, %arg7: memref<2x8xf32, #tpu.memory_space<vmem>>, %arg8: memref<2x32xf32, #tpu.memory_space<vmem>>) attributes {dimension_semantics = [], scalar_prefetch = 0 : i64, scratch_operands = 0 : i64, tpu.core_type = #tpu.core_type<tc>} {
    %c0 = arith.constant 0 : index
    %c0_0 = arith.constant 0 : index
    %0 = vector.load %arg0[%c0, %c0_0] : memref<2x8xf32, #tpu.memory_space<vmem>>, vector<2x8xf32>
    %c0_1 = arith.constant 0 : index
    %c0_2 = arith.constant 0 : index
    %1 = vector.load %arg1[%c0_1, %c0_2] : memref<2x32xf32, #tpu.memory_space<vmem>>, vector<2x32xf32>
    %c0_3 = arith.constant 0 : index
    %c0_4 = arith.constant 0 : index
    %2 = vector.load %arg2[%c0_3, %c0_4] : memref<1x32xf32, #tpu.memory_space<vmem>>, vector<1x32xf32>
    %c0_5 = arith.constant 0 : index
    %c0_6 = arith.constant 0 : index
    %3 = vector.load %arg3[%c0_5, %c0_6] : memref<32x32xf32, #tpu.memory_space<vmem>>, vector<32x32xf32>
    %c0_7 = arith.constant 0 : index
    %c0_8 = arith.constant 0 : index
    %4 = vector.load %arg4[%c0_7, %c0_8] : memref<1x32xf32, #tpu.memory_space<vmem>>, vector<1x32xf32>
    %c0_9 = arith.constant 0 : index
    %c0_10 = arith.constant 0 : index
    %5 = vector.load %arg5[%c0_9, %c0_10] : memref<1x32xf32, #tpu.memory_space<vmem>>, vector<1x32xf32>
    %c0_11 = arith.constant 0 : index
    %6 = memref.load %arg6[%c0_11] : memref<1xf32, #tpu.memory_space<smem>>
    %7 = vector.extract_strided_slice %0 {offsets = [0, 0], sizes = [2, 1], strides = [1, 1]} : vector<2x8xf32> to vector<2x1xf32>
    %8 = vector.broadcast %7 : vector<2x1xf32> to vector<2x32xf32>
    %9 = vector.broadcast %2 : vector<1x32xf32> to vector<2x32xf32>
    %10 = arith.mulf %8, %9 : vector<2x32xf32>
    %cst = arith.constant dense<0.000000e+00> : vector<2x32xf32>
    %11 = tpu.matmul %1, %3, %cst {dimension_numbers = #tpu.dot_dimension_numbers<[1], [0], [0], [1], [0, 0, 1, 1], [], []>} : vector<2x32xf32>, vector<32x32xf32>, vector<2x32xf32> -> vector<2x32xf32>
    %12 = arith.addf %10, %11 : vector<2x32xf32>
    %13 = vector.broadcast %4 : vector<1x32xf32> to vector<2x32xf32>
    %14 = arith.addf %12, %13 : vector<2x32xf32>
    %15 = math.tanh %14 : vector<2x32xf32>
    %16 = vector.broadcast %5 : vector<1x32xf32> to vector<2x32xf32>
    %17 = arith.mulf %15, %16 : vector<2x32xf32>
    %cst_12 = arith.constant dense<0.000000e+00> : vector<2xf32>
    %18 = vector.multi_reduction <add>, %17, %cst_12 [1] : vector<2x32xf32> to vector<2xf32>
    %19 = vector.shape_cast %18 : vector<2xf32> to vector<2x1xf32>
    %20 = vector.broadcast %6 : f32 to vector<2x1xf32>
    %21 = arith.addf %19, %20 : vector<2x1xf32>
    %c0_13 = arith.constant 0 : index
    %c0_14 = arith.constant 0 : index
    %22 = vector.load %arg7[%c0_13, %c0_14] : memref<2x8xf32, #tpu.memory_space<vmem>>, vector<2x1xf32>
    tpu.vector_store %arg7[%c0_13, %c0_14], %21 {strides = array<i32>} : memref<2x8xf32, #tpu.memory_space<vmem>>, vector<2x1xf32>,
    %23 = vector.extract_strided_slice %0 {offsets = [0, 1], sizes = [2, 1], strides = [1, 1]} : vector<2x8xf32> to vector<2x1xf32>
    %24 = vector.broadcast %23 : vector<2x1xf32> to vector<2x32xf32>
    %25 = vector.broadcast %2 : vector<1x32xf32> to vector<2x32xf32>
    %26 = arith.mulf %24, %25 : vector<2x32xf32>
    %cst_15 = arith.constant dense<0.000000e+00> : vector<2x32xf32>
    %27 = tpu.matmul %15, %3, %cst_15 {dimension_numbers = #tpu.dot_dimension_numbers<[1], [0], [0], [1], [0, 0, 1, 1], [], []>} : vector<2x32xf32>, vector<32x32xf32>, vector<2x32xf32> -> vector<2x32xf32>
    %28 = arith.addf %26, %27 : vector<2x32xf32>
    %29 = vector.broadcast %4 : vector<1x32xf32> to vector<2x32xf32>
    %30 = arith.addf %28, %29 : vector<2x32xf32>
    %31 = math.tanh %30 : vector<2x32xf32>
    %32 = vector.broadcast %5 : vector<1x32xf32> to vector<2x32xf32>
    %33 = arith.mulf %31, %32 : vector<2x32xf32>
    %cst_16 = arith.constant dense<0.000000e+00> : vector<2xf32>
    %34 = vector.multi_reduction <add>, %33, %cst_16 [1] : vector<2x32xf32> to vector<2xf32>
    %35 = vector.shape_cast %34 : vector<2xf32> to vector<2x1xf32>
    %36 = vector.broadcast %6 : f32 to vector<2x1xf32>
    %37 = arith.addf %35, %36 : vector<2x1xf32>
    %c0_17 = arith.constant 0 : index
    %c1 = arith.constant 1 : index
    %38 = vector.load %arg7[%c0_17, %c1] : memref<2x8xf32, #tpu.memory_space<vmem>>, vector<2x1xf32>
    tpu.vector_store %arg7[%c0_17, %c1], %37 {strides = array<i32>} : memref<2x8xf32, #tpu.memory_space<vmem>>, vector<2x1xf32>,
    %39 = vector.extract_strided_slice %0 {offsets = [0, 2], sizes = [2, 1], strides = [1, 1]} : vector<2x8xf32> to vector<2x1xf32>
    %40 = vector.broadcast %39 : vector<2x1xf32> to vector<2x32xf32>
    %41 = vector.broadcast %2 : vector<1x32xf32> to vector<2x32xf32>
    %42 = arith.mulf %40, %41 : vector<2x32xf32>
    %cst_18 = arith.constant dense<0.000000e+00> : vector<2x32xf32>
    %43 = tpu.matmul %31, %3, %cst_18 {dimension_numbers = #tpu.dot_dimension_numbers<[1], [0], [0], [1], [0, 0, 1, 1], [], []>} : vector<2x32xf32>, vector<32x32xf32>, vector<2x32xf32> -> vector<2x32xf32>
    %44 = arith.addf %42, %43 : vector<2x32xf32>
    %45 = vector.broadcast %4 : vector<1x32xf32> to vector<2x32xf32>
    %46 = arith.addf %44, %45 : vector<2x32xf32>
    %47 = math.tanh %46 : vector<2x32xf32>
    %48 = vector.broadcast %5 : vector<1x32xf32> to vector<2x32xf32>
    %49 = arith.mulf %47, %48 : vector<2x32xf32>
    %cst_19 = arith.constant dense<0.000000e+00> : vector<2xf32>
    %50 = vector.multi_reduction <add>, %49, %cst_19 [1] : vector<2x32xf32> to vector<2xf32>
    %51 = vector.shape_cast %50 : vector<2xf32> to vector<2x1xf32>
    %52 = vector.broadcast %6 : f32 to vector<2x1xf32>
    %53 = arith.addf %51, %52 : vector<2x1xf32>
    %c0_20 = arith.constant 0 : index
    %c2 = arith.constant 2 : index
    %54 = vector.load %arg7[%c0_20, %c2] : memref<2x8xf32, #tpu.memory_space<vmem>>, vector<2x1xf32>
    tpu.vector_store %arg7[%c0_20, %c2], %53 {strides = array<i32>} : memref<2x8xf32, #tpu.memory_space<vmem>>, vector<2x1xf32>,
    %55 = vector.extract_strided_slice %0 {offsets = [0, 3], sizes = [2, 1], strides = [1, 1]} : vector<2x8xf32> to vector<2x1xf32>
    %56 = vector.broadcast %55 : vector<2x1xf32> to vector<2x32xf32>
    %57 = vector.broadcast %2 : vector<1x32xf32> to vector<2x32xf32>
    %58 = arith.mulf %56, %57 : vector<2x32xf32>
    %cst_21 = arith.constant dense<0.000000e+00> : vector<2x32xf32>
    %59 = tpu.matmul %47, %3, %cst_21 {dimension_numbers = #tpu.dot_dimension_numbers<[1], [0], [0], [1], [0, 0, 1, 1], [], []>} : vector<2x32xf32>, vector<32x32xf32>, vector<2x32xf32> -> vector<2x32xf32>
    %60 = arith.addf %58, %59 : vector<2x32xf32>
    %61 = vector.broadcast %4 : vector<1x32xf32> to vector<2x32xf32>
    %62 = arith.addf %60, %61 : vector<2x32xf32>
    %63 = math.tanh %62 : vector<2x32xf32>
    %64 = vector.broadcast %5 : vector<1x32xf32> to vector<2x32xf32>
    %65 = arith.mulf %63, %64 : vector<2x32xf32>
    %cst_22 = arith.constant dense<0.000000e+00> : vector<2xf32>
    %66 = vector.multi_reduction <add>, %65, %cst_22 [1] : vector<2x32xf32> to vector<2xf32>
    %67 = vector.shape_cast %66 : vector<2xf32> to vector<2x1xf32>
    %68 = vector.broadcast %6 : f32 to vector<2x1xf32>
    %69 = arith.addf %67, %68 : vector<2x1xf32>
    %c0_23 = arith.constant 0 : index
    %c3 = arith.constant 3 : index
    %70 = vector.load %arg7[%c0_23, %c3] : memref<2x8xf32, #tpu.memory_space<vmem>>, vector<2x1xf32>
    tpu.vector_store %arg7[%c0_23, %c3], %69 {strides = array<i32>} : memref<2x8xf32, #tpu.memory_space<vmem>>, vector<2x1xf32>,
    %71 = vector.extract_strided_slice %0 {offsets = [0, 4], sizes = [2, 1], strides = [1, 1]} : vector<2x8xf32> to vector<2x1xf32>
    %72 = vector.broadcast %71 : vector<2x1xf32> to vector<2x32xf32>
    %73 = vector.broadcast %2 : vector<1x32xf32> to vector<2x32xf32>
    %74 = arith.mulf %72, %73 : vector<2x32xf32>
    %cst_24 = arith.constant dense<0.000000e+00> : vector<2x32xf32>
    %75 = tpu.matmul %63, %3, %cst_24 {dimension_numbers = #tpu.dot_dimension_numbers<[1], [0], [0], [1], [0, 0, 1, 1], [], []>} : vector<2x32xf32>, vector<32x32xf32>, vector<2x32xf32> -> vector<2x32xf32>
    %76 = arith.addf %74, %75 : vector<2x32xf32>
    %77 = vector.broadcast %4 : vector<1x32xf32> to vector<2x32xf32>
    %78 = arith.addf %76, %77 : vector<2x32xf32>
    %79 = math.tanh %78 : vector<2x32xf32>
    %80 = vector.broadcast %5 : vector<1x32xf32> to vector<2x32xf32>
    %81 = arith.mulf %79, %80 : vector<2x32xf32>
    %cst_25 = arith.constant dense<0.000000e+00> : vector<2xf32>
    %82 = vector.multi_reduction <add>, %81, %cst_25 [1] : vector<2x32xf32> to vector<2xf32>
    %83 = vector.shape_cast %82 : vector<2xf32> to vector<2x1xf32>
    %84 = vector.broadcast %6 : f32 to vector<2x1xf32>
    %85 = arith.addf %83, %84 : vector<2x1xf32>
    %c0_26 = arith.constant 0 : index
    %c4 = arith.constant 4 : index
    %86 = vector.load %arg7[%c0_26, %c4] : memref<2x8xf32, #tpu.memory_space<vmem>>, vector<2x1xf32>
    tpu.vector_store %arg7[%c0_26, %c4], %85 {strides = array<i32>} : memref<2x8xf32, #tpu.memory_space<vmem>>, vector<2x1xf32>,
    %87 = vector.extract_strided_slice %0 {offsets = [0, 5], sizes = [2, 1], strides = [1, 1]} : vector<2x8xf32> to vector<2x1xf32>
    %88 = vector.broadcast %87 : vector<2x1xf32> to vector<2x32xf32>
    %89 = vector.broadcast %2 : vector<1x32xf32> to vector<2x32xf32>
    %90 = arith.mulf %88, %89 : vector<2x32xf32>
    %cst_27 = arith.constant dense<0.000000e+00> : vector<2x32xf32>
    %91 = tpu.matmul %79, %3, %cst_27 {dimension_numbers = #tpu.dot_dimension_numbers<[1], [0], [0], [1], [0, 0, 1, 1], [], []>} : vector<2x32xf32>, vector<32x32xf32>, vector<2x32xf32> -> vector<2x32xf32>
    %92 = arith.addf %90, %91 : vector<2x32xf32>
    %93 = vector.broadcast %4 : vector<1x32xf32> to vector<2x32xf32>
    %94 = arith.addf %92, %93 : vector<2x32xf32>
    %95 = math.tanh %94 : vector<2x32xf32>
    %96 = vector.broadcast %5 : vector<1x32xf32> to vector<2x32xf32>
    %97 = arith.mulf %95, %96 : vector<2x32xf32>
    %cst_28 = arith.constant dense<0.000000e+00> : vector<2xf32>
    %98 = vector.multi_reduction <add>, %97, %cst_28 [1] : vector<2x32xf32> to vector<2xf32>
    %99 = vector.shape_cast %98 : vector<2xf32> to vector<2x1xf32>
    %100 = vector.broadcast %6 : f32 to vector<2x1xf32>
    %101 = arith.addf %99, %100 : vector<2x1xf32>
    %c0_29 = arith.constant 0 : index
    %c5 = arith.constant 5 : index
    %102 = vector.load %arg7[%c0_29, %c5] : memref<2x8xf32, #tpu.memory_space<vmem>>, vector<2x1xf32>
    tpu.vector_store %arg7[%c0_29, %c5], %101 {strides = array<i32>} : memref<2x8xf32, #tpu.memory_space<vmem>>, vector<2x1xf32>,
    %103 = vector.extract_strided_slice %0 {offsets = [0, 6], sizes = [2, 1], strides = [1, 1]} : vector<2x8xf32> to vector<2x1xf32>
    %104 = vector.broadcast %103 : vector<2x1xf32> to vector<2x32xf32>
    %105 = vector.broadcast %2 : vector<1x32xf32> to vector<2x32xf32>
    %106 = arith.mulf %104, %105 : vector<2x32xf32>
    %cst_30 = arith.constant dense<0.000000e+00> : vector<2x32xf32>
    %107 = tpu.matmul %95, %3, %cst_30 {dimension_numbers = #tpu.dot_dimension_numbers<[1], [0], [0], [1], [0, 0, 1, 1], [], []>} : vector<2x32xf32>, vector<32x32xf32>, vector<2x32xf32> -> vector<2x32xf32>
    %108 = arith.addf %106, %107 : vector<2x32xf32>
    %109 = vector.broadcast %4 : vector<1x32xf32> to vector<2x32xf32>
    %110 = arith.addf %108, %109 : vector<2x32xf32>
    %111 = math.tanh %110 : vector<2x32xf32>
    %112 = vector.broadcast %5 : vector<1x32xf32> to vector<2x32xf32>
    %113 = arith.mulf %111, %112 : vector<2x32xf32>
    %cst_31 = arith.constant dense<0.000000e+00> : vector<2xf32>
    %114 = vector.multi_reduction <add>, %113, %cst_31 [1] : vector<2x32xf32> to vector<2xf32>
    %115 = vector.shape_cast %114 : vector<2xf32> to vector<2x1xf32>
    %116 = vector.broadcast %6 : f32 to vector<2x1xf32>
    %117 = arith.addf %115, %116 : vector<2x1xf32>
    %c0_32 = arith.constant 0 : index
    %c6 = arith.constant 6 : index
    %118 = vector.load %arg7[%c0_32, %c6] : memref<2x8xf32, #tpu.memory_space<vmem>>, vector<2x1xf32>
    tpu.vector_store %arg7[%c0_32, %c6], %117 {strides = array<i32>} : memref<2x8xf32, #tpu.memory_space<vmem>>, vector<2x1xf32>,
    %119 = vector.extract_strided_slice %0 {offsets = [0, 7], sizes = [2, 1], strides = [1, 1]} : vector<2x8xf32> to vector<2x1xf32>
    %120 = vector.broadcast %119 : vector<2x1xf32> to vector<2x32xf32>
    %121 = vector.broadcast %2 : vector<1x32xf32> to vector<2x32xf32>
    %122 = arith.mulf %120, %121 : vector<2x32xf32>
    %cst_33 = arith.constant dense<0.000000e+00> : vector<2x32xf32>
    %123 = tpu.matmul %111, %3, %cst_33 {dimension_numbers = #tpu.dot_dimension_numbers<[1], [0], [0], [1], [0, 0, 1, 1], [], []>} : vector<2x32xf32>, vector<32x32xf32>, vector<2x32xf32> -> vector<2x32xf32>
    %124 = arith.addf %122, %123 : vector<2x32xf32>
    %125 = vector.broadcast %4 : vector<1x32xf32> to vector<2x32xf32>
    %126 = arith.addf %124, %125 : vector<2x32xf32>
    %127 = math.tanh %126 : vector<2x32xf32>
    %128 = vector.broadcast %5 : vector<1x32xf32> to vector<2x32xf32>
    %129 = arith.mulf %127, %128 : vector<2x32xf32>
    %cst_34 = arith.constant dense<0.000000e+00> : vector<2xf32>
    %130 = vector.multi_reduction <add>, %129, %cst_34 [1] : vector<2x32xf32> to vector<2xf32>
    %131 = vector.shape_cast %130 : vector<2xf32> to vector<2x1xf32>
    %132 = vector.broadcast %6 : f32 to vector<2x1xf32>
    %133 = arith.addf %131, %132 : vector<2x1xf32>
    %c0_35 = arith.constant 0 : index
    %c7 = arith.constant 7 : index
    %134 = vector.load %arg7[%c0_35, %c7] : memref<2x8xf32, #tpu.memory_space<vmem>>, vector<2x1xf32>
    tpu.vector_store %arg7[%c0_35, %c7], %133 {strides = array<i32>} : memref<2x8xf32, #tpu.memory_space<vmem>>, vector<2x1xf32>,
    %c0_36 = arith.constant 0 : index
    %c0_37 = arith.constant 0 : index
    %135 = vector.load %arg8[%c0_36, %c0_37] : memref<2x32xf32, #tpu.memory_space<vmem>>, vector<2x32xf32>
    tpu.vector_store %arg8[%c0_36, %c0_37], %127 {strides = array<i32>} : memref<2x32xf32, #tpu.memory_space<vmem>>, vector<2x32xf32>,
    return
  }
}

</mosaic_0001>

<bundles_post_ra>
// kernel: tpu_custom_call.1
= control target key start
LH: loop header
LB: loop body
LE: loop exit
PB: predicated region body
PF: predicated region fallthrough
CT: control target
= control target key end

     0   :  { %15 = vsyncpa [#allocation4], 0  ;;  %s733_s0 = inlined_call_operand.vmem [shape: f32[2,8], index: 0, kind: input, shape index: {}]   ;;  %s734_s1 = inlined_call_operand.hbm [shape: f32[2,32], index: 1, kind: input, shape index: {}]   ;;  %s735_s2 = inlined_call_operand.vmem [shape: f32[1,32], index: 2, kind: input, shape index: {}]   ;;  %s736_s3 = inlined_call_operand.hbm [shape: f32[32,32], index: 3, kind: input, shape index: {}]   ;;  %s737_s4 = inlined_call_operand.vmem [shape: f32[1,32], index: 4, kind: input, shape index: {}]   ;;  %s738_s5 = inlined_call_operand.vmem [shape: f32[1,32], index: 5, kind: input, shape index: {}]   ;;  %s739_s6 = inlined_call_operand.<no memory space> [shape: f32[1], index: 6, kind: input, shape index: {}]   ;;  %s740_s7 = inlined_call_operand.hbm [shape: f32[2,8], index: 7, kind: output, shape index: {0}]   ;;  %s741_s8 = inlined_call_operand.hbm [shape: f32[2,32], index: 8, kind: output, shape index: {1}]  }
   0x1   :  { %16 = vsyncpa [#allocation7], 0 }
   0x2   :  { %17 = vsyncpa [#allocation5], 0 }
   0x3   :  { %18 = vsyncpa [#allocation10], 0  ;;  %s26_s29 = sshll.u32 %s734_s1, 4  ;;  %s577_s30 = smov [#allocation3]   ;;  %s27_s29 = int_to_ptr.hbm [resolvable:$true] %s26_s29 }
   0x4   :  { %s28_s9 = sshll.u32 %s577_s30, 4  ;;  %s38_s12 = sshll.u32 %s736_s3, 4  ;;  %s29_s9 = int_to_ptr.vmem [resolvable:$true] %s28_s9  ;;  %s39_s12 = int_to_ptr.hbm [resolvable:$true] %s38_s12 }
   0x5   :  { %31 = dma.hbm_to_vmem [thread:$0]  %s27_s29, 32, %s29_s9, [#allocation4]  }
   0x6   :  { %s578_s13 = smov [#allocation6]   ;;  %s579_s15 = smov 128  }
   0x7   :  { %s40_s14 = sshll.u32 %s578_s13, 4  ;;  %s580_s16 = smov 8   ;;  %s41_s14 = int_to_ptr.vmem [resolvable:$true] %s40_s14 }
   0x8   :  { %46 = dma.hbm_to_vmem [thread:$0]  %s39_s12, 512, %s41_s14, [#allocation7], %s579_s15, %s579_s15, %s580_s16  }
   0x9   :  { %569 = dma.done.wait [#allocation4], 32  }
   0xa   :  { %570 = vsyncadd [#allocation4], 4294967264 }
   0xb   :  { %571 = dma.done.wait [#allocation7], 512  }
   0xc   :  { %572 = vsyncadd [#allocation7], 4294966784  ;;  %v581_v0 = vmov 0   ;;  %v582_v1 = vmov 4   ;;  %v67_v2 = vld [vmem:[#allocation6 + $0x18] sm:$0xff]  ;;  %v66_v3 = vld [vmem:[#allocation6 + $0x10] sm:$0xff]  ;;  %v678_v24 = vstv %s739_s6 }
   0xd   :  { %445 = vset.pattern.permute.xlu0 %v581_v0  ;;  %449 = vset.pattern.permute.xlu2 %v582_v1  ;;  %v645_v4 = vld [vmem:[%s733_s0] sm:$0x3]  ;;  %v65_v5 = vld [vmem:[#allocation6 + $0x8] sm:$0xff]  ;;  %v64_v6 = vld [vmem:[#allocation6] sm:$0xff]  ;;  %vm80_vm0 = vcmask 261120   ;;  %v583_v8 = vmov 5  }
   0xe   :  { %96 = vmatpush.msra.mxu0 %v67_v2  ;;  %142 = vmatpush.msra.mxu1 %v67_v2  ;;  %v62_v7 = vld [vmem:[#allocation3] sm:$0x3]  ;;  %v584_v9 = vmov 1   ;;  %vm114_vm1 = vcmask 254976   ;;  %v585_v23 = vmov 2   ;;  %vm120_vm2 = vcmask 1024  }
   0xf   :  { %73 = vperm.xlu0 %445, %v645_v4   ;;  %237 = vperm.xlu2 %449, %v645_v4   ;;  %v655_v10 = vld [vmem:[%s735_s2] ss:$0 sm:$0xff]  ;;  %v586_v26 = vmov 3   ;;  %v587_v32 = vmov 6   ;;  %vm158_vm3 = vcmask 9224   ;;  %vm196_vm4 = vcmask 17424  }
  0x10   :  { %97 = vmatpush.msra.mxu0 %v66_v3  ;;  %143 = vmatpush.msra.mxu1 %v66_v3  ;;  %v661_v13 = vld [vmem:[%s737_s4] ss:$0 sm:$0xff]  ;;  %vm234_vm5 = vcmask 25624   ;;  %vm272_vm6 = vcmask 33824   ;;  %vm310_vm7 = vcmask 42024   ;;  %vm348_vm8 = vcmask 50224  }
  0x11   :  { %180 = vmatpush.msra.mxu2 %v67_v2  ;;  %218 = vmatpush.msra.mxu3 %v67_v2  ;;  %v667_v17 = vld [vmem:[%s738_s5] ss:$0 sm:$0xff]  ;;  %s589_s5 = smov [#allocation9]   ;;  %s407_s24 = sshll.u32 %s741_s8, 4  ;;  %vm386_vm9 = vcmask 58424   ;;  %s408_s24 = int_to_ptr.hbm [resolvable:$true] %s407_s24 }
  0x12   :  { %98 = vmatpush.msra.mxu0 %v65_v5  ;;  %144 = vmatpush.msra.mxu1 %v65_v5  ;;  %s405_s6 = sshll.u32 %s589_s5, 4  ;;  %s590_s25 = smov [#allocation8]   ;;  %s406_s6 = int_to_ptr.vmem [resolvable:$true] %s405_s6 }
  0x13   :  { %181 = vmatpush.msra.mxu2 %v66_v3  ;;  %219 = vmatpush.msra.mxu3 %v66_v3  ;;  %s394_s26 = sshll.u32 %s590_s25, 4  ;;  %s396_s29 = sshll.u32 %s740_s7, 4  ;;  %s395_s26 = int_to_ptr.vmem [resolvable:$true] %s394_s26  ;;  %s397_s29 = int_to_ptr.hbm [resolvable:$true] %s396_s29 }
  0x14   :  { %99 = vmatpush.msra.mxu0 %v64_v6  ;;  %145 = vmatpush.msra.mxu1 %v64_v6 }
  0x15   :  { %423 = vmatmul.msk.f32.vlgmr.msra.gmra.mxu0 %vm80_vm0, %v62_v7  ;;  %182 = vmatpush.msra.mxu2 %v65_v5 }
  0x16   :  { %220 = vmatpush.msra.mxu3 %v65_v5  ;;  %256 = vmatpush.msrb.mxu0 %v67_v2 }
  0x17   :  { %450 = vset.pattern.permute.xlu2 %v583_v8  ;;  %183 = vmatpush.msra.mxu2 %v64_v6 }
  0x18   :  { %275 = vperm.xlu2 %450, %v645_v4   ;;  %221 = vmatpush.msra.mxu3 %v64_v6 }
  0x19   :  { %257 = vmatpush.msrb.mxu0 %v66_v3  ;;  %294 = vmatpush.msrb.mxu1 %v67_v2 }
  0x1a   :  { %332 = vmatpush.msrb.mxu2 %v67_v2  ;;  %370 = vmatpush.msrb.mxu3 %v67_v2 }
  0x1b   :  { %258 = vmatpush.msrb.mxu0 %v65_v5  ;;  %295 = vmatpush.msrb.mxu1 %v66_v3 }
  0x1c   :  { %333 = vmatpush.msrb.mxu2 %v66_v3  ;;  %371 = vmatpush.msrb.mxu3 %v66_v3 }
  0x1d   :  { %259 = vmatpush.msrb.mxu0 %v64_v6  ;;  %296 = vmatpush.msrb.mxu1 %v65_v5 }
  0x1e   :  { %334 = vmatpush.msrb.mxu2 %v65_v5  ;;  %372 = vmatpush.msrb.mxu3 %v65_v5 }
  0x1f   :  { %297 = vmatpush.msrb.mxu1 %v64_v6  ;;  %446 = vset.pattern.permute.xlu0 %v584_v9 }
  0x20   :  { %335 = vmatpush.msrb.mxu2 %v64_v6  ;;  %373 = vmatpush.msrb.mxu3 %v64_v6 }
  0x21   :  { %123 = vperm.xlu0 %446, %v645_v4   ;;  %447 = vset.pattern.permute.xlu1 %v585_v23 }
  0x22   :  { %161 = vperm.xlu1 %447, %v645_v4  }
  0x2a   :  { %448 = vset.pattern.permute.xlu1 %v586_v26 }
  0x2b   :  { %199 = vperm.xlu1 %448, %v645_v4  }
  0x33   :  { %451 = vset.pattern.permute.xlu1 %v587_v32 }
  0x34   :  { %313 = vperm.xlu1 %451, %v645_v4  }
  0x69   :  { %v238_v21 = vpop.permute.xlu2 %237 }
  0x6a   :  { %v240_v60 = vmul.f32 %v655_v10, %v238_v21 }
  0x72   :  { %v672_v22 = vpop.permute.xlu2 %275 }
  0x73   :  { %v278_v6 = vmul.f32 %v655_v10, %v672_v22 }
  0x81   :  { %v74_v11 = vpop.permute.xlu0 %73 }
  0x82   :  { %v79_v12 = vmul.f32 %v655_v10, %v74_v11 }
  0x92   :  { %v101_v14 = vpop.f32.mrf.mxu0 }
  0x93   :  { %v104_v15 = vadd.f32 %v101_v14, %v79_v12  ;;  %v124_v28 = vpop.permute.xlu0 %123 }
  0x94   :  { %v126_v29 = vmul.f32 %v655_v10, %v124_v28  ;;  %v162_v39 = vpop.permute.xlu1 %161 }
  0x95   :  { %v108_v16 = vadd.f32 %v661_v13, %v104_v15  ;;  %v164_v40 = vmul.f32 %v655_v10, %v162_v39  ;;  %v588_v15 = vmov 7  }
  0x96   :  { %452 = vset.pattern.permute.xlu2 %v588_v15  ;;  %453 = vset.pattern.permute.xlu0 %v588_v15 }
  0x97   :  { %457 = vtanh.f32 %v108_v16 }
  0x9d   :  { %v458_v18 = vpop.eup %457  ;;  %v200_v47 = vpop.permute.xlu1 %199 }
  0x9e   :  { %424 = vmatmul.msk.f32.vlgmr.msra.gmra.mxu1 %vm80_vm0, %v458_v18  ;;  %v113_v19 = vmul.f32 %v458_v18, %v667_v17  ;;  %v202_v51 = vmul.f32 %v655_v10, %v200_v47 }
  0xa0   :  { %v115_v20 = vsel %vm114_vm1, %v113_v19, 0.0 }
  0xa1   :  { %116 = vadd.xlane.f32.xlu2 %v115_v20 }
  0xa6   :  { %v314_v48 = vpop.permute.xlu1 %313 }
  0xa7   :  { %v316_v19 = vmul.f32 %v655_v10, %v314_v48 }
 0x114   :  { %v117_v25 = vpop.xlane.xlu2 %116 }
 0x115   :  { %v119_v27 = vadd.f32 %v678_v24, %v117_v25 }
 0x117   :  { %121 = vst.msk [vmem:[#allocation8] sm:$0x3] %vm120_vm2, %v119_v27 }
 0x11b   :  { %v147_v30 = vpop.f32.mrf.mxu1 }
 0x11c   :  { %v150_v31 = vadd.f32 %v147_v30, %v126_v29 }
 0x11e   :  { %v151_v33 = vadd.f32 %v661_v13, %v150_v31 }
 0x120   :  { %459 = vtanh.f32 %v151_v33 }
 0x126   :  { %v460_v34 = vpop.eup %459 }
 0x127   :  { %425 = vmatmul.msk.f32.vlgmr.msra.gmra.mxu2 %vm80_vm0, %v460_v34  ;;  %v153_v35 = vmul.f32 %v460_v34, %v667_v17 }
 0x129   :  { %v154_v36 = vsel %vm114_vm1, %v153_v35, 0.0 }
 0x12a   :  { %155 = vadd.xlane.f32.xlu0 %v154_v36 }
 0x19d   :  { %v156_v37 = vpop.xlane.xlu0 %155 }
 0x19e   :  { %v157_v38 = vadd.f32 %v156_v37, %v678_v24 }
 0x1a0   :  { %159 = vst.msk [vmem:[#allocation8] sm:$0x3] %vm158_vm3, %v157_v38 }
 0x1aa   :  { %v185_v41 = vpop.f32.mrf.mxu2 }
 0x1ab   :  { %v188_v42 = vadd.f32 %v185_v41, %v164_v40 }
 0x1ad   :  { %v189_v43 = vadd.f32 %v661_v13, %v188_v42 }
 0x1af   :  { %461 = vtanh.f32 %v189_v43 }
 0x1b5   :  { %v462_v44 = vpop.eup %461 }
 0x1b6   :  { %426 = vmatmul.msk.f32.vlgmr.msra.gmra.mxu3 %vm80_vm0, %v462_v44  ;;  %v191_v45 = vmul.f32 %v462_v44, %v667_v17 }
 0x1b8   :  { %v192_v46 = vsel %vm114_vm1, %v191_v45, 0.0 }
 0x1b9   :  { %193 = vadd.xlane.f32.xlu1 %v192_v46 }
 0x22c   :  { %v194_v49 = vpop.xlane.xlu1 %193 }
 0x22d   :  { %v195_v50 = vadd.f32 %v194_v49, %v678_v24 }
 0x22f   :  { %197 = vst.msk [vmem:[#allocation8] sm:$0x3] %vm196_vm4, %v195_v50 }
 0x239   :  { %v223_v52 = vpop.f32.mrf.mxu3 }
 0x23a   :  { %v226_v53 = vadd.f32 %v223_v52, %v202_v51 }
 0x23c   :  { %v227_v54 = vadd.f32 %v661_v13, %v226_v53 }
 0x23e   :  { %463 = vtanh.f32 %v227_v54 }
 0x244   :  { %v464_v55 = vpop.eup %463 }
 0x245   :  { %427 = vmatmul.msk.f32.vlgmr.msrb.gmra.mxu0 %vm80_vm0, %v464_v55  ;;  %v229_v56 = vmul.f32 %v464_v55, %v667_v17 }
 0x247   :  { %v230_v57 = vsel %vm114_vm1, %v229_v56, 0.0 }
 0x248   :  { %231 = vadd.xlane.f32.xlu2 %v230_v57 }
 0x2bb   :  { %v232_v58 = vpop.xlane.xlu2 %231 }
 0x2bc   :  { %v233_v59 = vadd.f32 %v232_v58, %v678_v24 }
 0x2be   :  { %235 = vst.msk [vmem:[#allocation8] sm:$0x3] %vm234_vm5, %v233_v59 }
 0x2c2   :  { %v261_v61 = vpop.f32.mrf.mxu0 }
 0x2c3   :  { %v264_v62 = vadd.f32 %v261_v61, %v240_v60 }
 0x2c5   :  { %v265_v63 = vadd.f32 %v661_v13, %v264_v62 }
 0x2c7   :  { %465 = vtanh.f32 %v265_v63 }
 0x2cd   :  { %v466_v0 = vpop.eup %465 }
 0x2ce   :  { %428 = vmatmul.msk.f32.vlgmr.msrb.gmra.mxu1 %vm80_vm0, %v466_v0  ;;  %v267_v1 = vmul.f32 %v466_v0, %v667_v17 }
 0x2d0   :  { %v268_v2 = vsel %vm114_vm1, %v267_v1, 0.0 }
 0x2d1   :  { %269 = vadd.xlane.f32.xlu2 %v268_v2 }
 0x2e9   :  { %351 = vperm.xlu2 %452, %v645_v4  }
 0x344   :  { %v270_v3 = vpop.xlane.xlu2 %269 }
 0x345   :  { %v271_v5 = vadd.f32 %v270_v3, %v678_v24 }
 0x347   :  { %273 = vst.msk [vmem:[#allocation8] sm:$0x3] %vm272_vm6, %v271_v5 }
 0x34b   :  { %v299_v7 = vpop.f32.mrf.mxu1 }
 0x34c   :  { %v302_v8 = vadd.f32 %v299_v7, %v278_v6  ;;  %v352_v28 = vpop.permute.xlu2 %351 }
 0x34d   :  { %v354_v29 = vmul.f32 %v655_v10, %v352_v28 }
 0x34e   :  { %v303_v9 = vadd.f32 %v661_v13, %v302_v8 }
 0x350   :  { %467 = vtanh.f32 %v303_v9 }
 0x356   :  { %v468_v11 = vpop.eup %467 }
 0x357   :  { %429 = vmatmul.msk.f32.vlgmr.msrb.gmra.mxu2 %vm80_vm0, %v468_v11  ;;  %v305_v12 = vmul.f32 %v468_v11, %v667_v17 }
 0x359   :  { %v306_v14 = vsel %vm114_vm1, %v305_v12, 0.0 }
 0x35a   :  { %307 = vadd.xlane.f32.xlu0 %v306_v14 }
 0x3cd   :  { %v308_v16 = vpop.xlane.xlu0 %307 }
 0x3ce   :  { %v309_v18 = vadd.f32 %v308_v16, %v678_v24 }
 0x3d0   :  { %311 = vst.msk [vmem:[#allocation8] sm:$0x3] %vm310_vm7, %v309_v18 }
 0x3da   :  { %v337_v20 = vpop.f32.mrf.mxu2 }
 0x3db   :  { %v340_v21 = vadd.f32 %v337_v20, %v316_v19 }
 0x3dd   :  { %v341_v22 = vadd.f32 %v661_v13, %v340_v21 }
 0x3df   :  { %469 = vtanh.f32 %v341_v22 }
 0x3e5   :  { %v470_v23 = vpop.eup %469 }
 0x3e6   :  { %430 = vmatmul.msk.f32.vlgmr.msrb.gmra.mxu3 %vm80_vm0, %v470_v23  ;;  %v343_v25 = vmul.f32 %v470_v23, %v667_v17 }
 0x3e8   :  { %v344_v26 = vsel %vm114_vm1, %v343_v25, 0.0 }
 0x3e9   :  { %345 = vadd.xlane.f32.xlu1 %v344_v26 }
 0x45c   :  { %v346_v4 = vpop.xlane.xlu1 %345 }
 0x45d   :  { %v347_v27 = vadd.f32 %v346_v4, %v678_v24 }
 0x45f   :  { %349 = vst.msk [vmem:[#allocation8] sm:$0x3] %vm348_vm8, %v347_v27 }
 0x469   :  { %v375_v30 = vpop.f32.mrf.mxu3 }
 0x46a   :  { %v378_v31 = vadd.f32 %v375_v30, %v354_v29 }
 0x46c   :  { %v379_v32 = vadd.f32 %v661_v13, %v378_v31 }
 0x46e   :  { %471 = vtanh.f32 %v379_v32 }
 0x474   :  { %v472_v33 = vpop.eup %471 }
 0x475   :  { %388 = vst.msk [vmem:[#allocation9] sm:$0x3] %vm114_vm1, %v472_v33  ;;  %v381_v34 = vmul.f32 %v472_v33, %v667_v17 }
 0x476   :  { %410 = dma.vmem_to_hbm [thread:$0]  %s406_s6, 32, %s408_s24, [#allocation10]  }
 0x477   :  { %v382_v10 = vsel %vm114_vm1, %v381_v34, 0.0 }
 0x478   :  { %383 = vadd.xlane.f32.xlu0 %v382_v10 }
 0x4eb   :  { %v384_v13 = vpop.xlane.xlu0 %383 }
 0x4ec   :  { %v385_v35 = vadd.f32 %v384_v13, %v678_v24 }
 0x4ee   :  { %387 = vst.msk [vmem:[#allocation8] sm:$0x3] %vm386_vm9, %v385_v35 }
 0x4ef   :  { %399 = dma.vmem_to_hbm [thread:$0]  %s395_s26, 32, %s397_s29, [#allocation5]  }
 0x4f0   :  { %573 = dma.done.wait [#allocation5], 32  }
 0x4f1   :  { %574 = vsyncadd [#allocation5], 4294967264 }
 0x4f2   :  { %575 = dma.done.wait [#allocation10], 32  }
 0x4f3   :  { %576 = vsyncadd [#allocation10], 4294967264 }
 0x4f4   :  { %419 = vsyncpa [#allocation4], 1 }
 0x4f5   :  { %420 = vsyncpa [#allocation7], 1 }
 0x4f6   :  { %421 = vsyncpa [#allocation5], 1 }
 0x4f7   :  { %422 = vsyncpa [#allocation10], 1 }

</bundles_post_ra>
